<compile_context>
chip_gen: v5e
topology: v5e:2x2
jax: 0.10.0
libtpu: 0.0.40
codegen_flags: <defaults>
</compile_context>

<pallas_src>
import jax
import jax.numpy as jnp
from jax.experimental import pallas as pl
from jax.experimental.pallas import tpu as pltpu


def _linear_relu_kernel_acc(x_ref, w_ref, b_ref, o_ref, acc_ref):
    # x_ref: (tm, tk), w_ref: (tk, tn), b_ref: (1, tn),
    # o_ref: (tm, tn), acc_ref: (tm, tn) f32 scratch persistent over k.
    k = pl.program_id(2)

    @pl.when(k == 0)
    def _():
        acc_ref[...] = jnp.zeros_like(acc_ref)

    acc_ref[...] += jnp.dot(
        x_ref[...], w_ref[...], preferred_element_type=jnp.float32
    )

    @pl.when(k == pl.num_programs(2) - 1)
    def _():
        y = acc_ref[...] + b_ref[...]          # bias once per output tile
        o_ref[...] = jnp.maximum(y, 0.0).astype(o_ref.dtype)


def _linear_relu_kernel_single_k(x_ref, w_ref, b_ref, o_ref):
    # Whole K fits in one tile: no scratch, no phase gates.
    acc = jnp.dot(x_ref[...], w_ref[...], preferred_element_type=jnp.float32)
    o_ref[...] = jnp.maximum(acc + b_ref[...], 0.0).astype(o_ref.dtype)


def _round_up(x, m):
    return ((x + m - 1) // m) * m


def linear_relu(x, weight, bias, *, tm=256, tn=256, tk=512):
    """x: (..., K); weight: (N, K) torch-Linear layout; bias: (N,) -> (..., N)."""
    *lead, K = x.shape
    N, Kw = weight.shape
    assert K == Kw, f"in_features mismatch: {K} vs {Kw}"

    x2 = x.reshape(-1, K)
    M = x2.shape[0]
    w_t = weight.T  # (K, N): plain row-major matmul inside the kernel

    # Clamp tiles to the (padded) problem dims, honoring the (8, 128) rule.
    tm = min(tm, _round_up(M, 8))
    tn = min(tn, _round_up(N, 128))
    tk = min(tk, _round_up(K, 128))

    Mp = _round_up(M, tm)
    Np = _round_up(N, tn)
    Kp = _round_up(K, tk)

    x_p = x2 if (Mp == M and Kp == K) else jnp.pad(x2, ((0, Mp - M), (0, Kp - K)))
    w_p = w_t if (Kp == K and Np == N) else jnp.pad(w_t, ((0, Kp - K), (0, Np - N)))
    b_p = bias if Np == N else jnp.pad(bias, (0, Np - N))
    b2 = b_p.reshape(1, Np)

    cost = pl.CostEstimate(
        flops=2 * Mp * Np * Kp,
        transcendentals=0,
        bytes_accessed=(Mp * Kp + Kp * Np + Mp * Np + Np)
        * jnp.dtype(x.dtype).itemsize,
    )

    if Kp == tk:
        # -------- single K-step fast path: 2-D grid, no accumulator --------
        grid = (Mp // tm, Np // tn)
        out_p = pl.pallas_call(
            _linear_relu_kernel_single_k,
            out_shape=jax.ShapeDtypeStruct((Mp, Np), x.dtype),
            grid_spec=pltpu.PrefetchScalarGridSpec(
                num_scalar_prefetch=0,
                grid=grid,
                in_specs=[
                    pl.BlockSpec((tm, tk), lambda i, j: (i, 0)),   # x tile
                    pl.BlockSpec((tk, tn), lambda i, j: (0, j)),   # weight tile
                    pl.BlockSpec((1, tn), lambda i, j: (0, j)),    # bias tile
                ],
                out_specs=pl.BlockSpec((tm, tn), lambda i, j: (i, j)),
            ),
            compiler_params=pltpu.CompilerParams(
                dimension_semantics=("parallel", "parallel"),
                vmem_limit_bytes=64 * 1024 * 1024,
            ),
            cost_estimate=cost,
        )(x_p, w_p, b2)
    else:
        # -------- general path: 3-D grid with K-reduction accumulator --------
        grid = (Mp // tm, Np // tn, Kp // tk)
        out_p = pl.pallas_call(
            _linear_relu_kernel_acc,
            out_shape=jax.ShapeDtypeStruct((Mp, Np), x.dtype),
            grid_spec=pltpu.PrefetchScalarGridSpec(
                num_scalar_prefetch=0,
                grid=grid,
                in_specs=[
                    pl.BlockSpec((tm, tk), lambda i, j, k: (i, k)),   # x tile
                    pl.BlockSpec((tk, tn), lambda i, j, k: (k, j)),   # weight tile
                    pl.BlockSpec((1, tn), lambda i, j, k: (0, j)),    # bias tile
                ],
                out_specs=pl.BlockSpec((tm, tn), lambda i, j, k: (i, j)),
                scratch_shapes=[pltpu.VMEM((tm, tn), jnp.float32)],
            ),
            compiler_params=pltpu.CompilerParams(
                dimension_semantics=("parallel", "parallel", "arbitrary"),
                vmem_limit_bytes=64 * 1024 * 1024,
            ),
            cost_estimate=cost,
        )(x_p, w_p, b2)

    # Strip padding outside the kernel (keeps in-kernel stores lane-dense).
    out = out_p[:M, :N]
    return out.reshape(*lead, N)


if __name__ == "__main__":
    # Module config (synthetic, deterministic init — no checkpoint load).
    batch = 8
    in_channels = 32
    out_channels = 32

    key = jax.random.PRNGKey(0)
    kx, kw, kb, kx2 = jax.random.split(key, 4)

    x = jax.random.normal(kx, (batch, in_channels), dtype=jnp.float32)
    # nn.Linear weight layout: (out_channels, in_channels)
    w = jax.random.normal(kw, (out_channels, in_channels), dtype=jnp.float32) * 0.1
    b = jax.random.normal(kb, (out_channels,), dtype=jnp.float32) * 0.1

    out = linear_relu(x, w, b)
    jax.block_until_ready(out)

    ref = jnp.maximum(x @ w.T + b[None, :], 0.0)
    assert out.shape == (batch, out_channels)
    assert jnp.allclose(out, ref, atol=1e-5, rtol=1e-5)

    # Extra check: awkward (non-aligned) shapes + leading batch dims exercise
    # the padding / flattening path.
    M2, K2, N2 = 5, 20, 7
    x2 = jax.random.normal(kx2, (2, M2, K2), dtype=jnp.float32)
    w2 = jax.random.normal(kw, (N2, K2), dtype=jnp.float32) * 0.1
    b2 = jax.random.normal(kb, (N2,), dtype=jnp.float32) * 0.1
    out2 = linear_relu(x2, w2, b2)
    jax.block_until_ready(out2)
    ref2 = jnp.maximum(jnp.einsum("bmk,nk->bmn", x2, w2) + b2, 0.0)
    assert out2.shape == (2, M2, N2)
    assert jnp.allclose(out2, ref2, atol=1e-5, rtol=1e-5)

    print("KERNEL_OK")
</pallas_src>

<mosaic_0001>
module attributes {stable_mosaic.version = 11 : i64} {
  func.func @_linear_relu_kernel_single_k(%arg0: i32, %arg1: i32, %arg2: memref<8x128xf32, #tpu.memory_space<vmem>>, %arg3: memref<128x128xf32, #tpu.memory_space<vmem>>, %arg4: memref<1x128xf32, #tpu.memory_space<vmem>>, %arg5: memref<8x128xf32, #tpu.memory_space<vmem>>) attributes {dimension_semantics = [#tpu.dimension_semantics<parallel>, #tpu.dimension_semantics<parallel>], iteration_bounds = array<i64: 1, 1>, scalar_prefetch = 0 : i64, scratch_operands = 0 : i64, tpu.core_type = #tpu.core_type<tc>, window_params = [{transform_indices = @transform_0, window_bounds = array<i64: 8, 128>}, {transform_indices = @transform_1, window_bounds = array<i64: 128, 128>}, {transform_indices = @transform_2, window_bounds = array<i64: 1, 128>}, {transform_indices = @transform_3, window_bounds = array<i64: 8, 128>}]} {
    %c0 = arith.constant 0 : index
    %c0_0 = arith.constant 0 : index
    %0 = vector.load %arg2[%c0, %c0_0] : memref<8x128xf32, #tpu.memory_space<vmem>>, vector<8x128xf32>
    %c0_1 = arith.constant 0 : index
    %c0_2 = arith.constant 0 : index
    %1 = vector.load %arg3[%c0_1, %c0_2] : memref<128x128xf32, #tpu.memory_space<vmem>>, vector<128x128xf32>
    %cst = arith.constant dense<0.000000e+00> : vector<8x128xf32>
    %2 = tpu.matmul %0, %1, %cst {dimension_numbers = #tpu.dot_dimension_numbers<[1], [0], [0], [1], [0, 0, 1, 1], [], []>} : vector<8x128xf32>, vector<128x128xf32>, vector<8x128xf32> -> vector<8x128xf32>
    %c0_3 = arith.constant 0 : index
    %c0_4 = arith.constant 0 : index
    %3 = vector.load %arg4[%c0_3, %c0_4] : memref<1x128xf32, #tpu.memory_space<vmem>>, vector<1x128xf32>
    %4 = vector.broadcast %3 : vector<1x128xf32> to vector<8x128xf32>
    %5 = arith.addf %2, %4 : vector<8x128xf32>
    %cst_5 = arith.constant 0.000000e+00 : f32
    %6 = vector.broadcast %cst_5 : f32 to vector<8x128xf32>
    %7 = arith.maximumf %5, %6 : vector<8x128xf32>
    %c0_6 = arith.constant 0 : index
    %c0_7 = arith.constant 0 : index
    %8 = vector.load %arg5[%c0_6, %c0_7] : memref<8x128xf32, #tpu.memory_space<vmem>>, vector<8x128xf32>
    tpu.vector_store %arg5[%c0_6, %c0_7], %7 {strides = array<i32>} : memref<8x128xf32, #tpu.memory_space<vmem>>, vector<8x128xf32>,
    return
  }
  func.func @transform_0(%arg0: i32, %arg1: i32) -> (i32, i32) {
    %c0_i32 = arith.constant 0 : i32
    %c0_i32_0 = arith.constant 0 : i32
    return %arg0, %c0_i32 : i32, i32
  }
  func.func @transform_1(%arg0: i32, %arg1: i32) -> (i32, i32) {
    %c0_i32 = arith.constant 0 : i32
    %c0_i32_0 = arith.constant 0 : i32
    return %c0_i32, %arg1 : i32, i32
  }
  func.func @transform_2(%arg0: i32, %arg1: i32) -> (i32, i32) {
    %c0_i32 = arith.constant 0 : i32
    %c0_i32_0 = arith.constant 0 : i32
    return %c0_i32, %arg1 : i32, i32
  }
  func.func @transform_3(%arg0: i32, %arg1: i32) -> (i32, i32) {
    %c0_i32 = arith.constant 0 : i32
    return %arg0, %arg1 : i32, i32
  }
}

</mosaic_0001>

<bundles_post_ra>
// kernel: tpu_custom_call.1
= control target key start
LH: loop header
LB: loop body
LE: loop exit
PB: predicated region body
PF: predicated region fallthrough
CT: control target
= control target key end

     0   :  { %8 = vsyncpa [#allocation3], 0  ;;  %s227_s0 = inlined_call_operand.hbm [shape: f32[8,128], index: 0, kind: input, shape index: {}]   ;;  %s228_s1 = inlined_call_operand.hbm [shape: f32[128,128], index: 1, kind: input, shape index: {}]   ;;  %s229_s2 = inlined_call_operand.vmem [shape: f32[1,128], index: 2, kind: input, shape index: {}]   ;;  %s230_s3 = inlined_call_operand.hbm [shape: f32[8,128], index: 3, kind: output, shape index: {}]  }
   0x1   :  { %9 = vsyncpa [#allocation6], 0 }
   0x2   :  { %10 = vsyncpa [#allocation4], 0  ;;  %s16_s14 = sshll.u32 %s227_s0, 4  ;;  %s190_s15 = smov [#allocation2]   ;;  %s17_s14 = int_to_ptr.hbm [resolvable:$true] %s16_s14 }
   0x3   :  { %s18_s16 = sshll.u32 %s190_s15, 4  ;;  %s26_s19 = sshll.u32 %s228_s1, 4  ;;  %s19_s16 = int_to_ptr.vmem [resolvable:$true] %s18_s16  ;;  %s27_s19 = int_to_ptr.hbm [resolvable:$true] %s26_s19 }
   0x4   :  { %21 = dma.hbm_to_vmem [thread:$0]  %s17_s14, 128, %s19_s16, [#allocation3]  }
   0x5   :  { %s191_s20 = smov [#allocation5]   ;;  %s192_s22 = smov 128  }
   0x6   :  { %s28_s21 = sshll.u32 %s191_s20, 4  ;;  %s193_s23 = smov 8   ;;  %s29_s21 = int_to_ptr.vmem [resolvable:$true] %s28_s21 }
   0x7   :  { %34 = dma.hbm_to_vmem [thread:$0]  %s27_s19, 2048, %s29_s21, [#allocation6], %s192_s22, %s192_s22, %s193_s23  }
   0x8   :  { %184 = dma.done.wait [#allocation3], 128  }
   0x9   :  { %185 = vsyncadd [#allocation3], 4294967168 }
   0xa   :  { %186 = dma.done.wait [#allocation6], 2048  }
   0xb   :  { %187 = vsyncadd [#allocation6], 4294965248  ;;  %v61_v0 = vld [vmem:[#allocation5 + $0x78] sm:$0xff]  ;;  %v60_v1 = vld [vmem:[#allocation5 + $0x70] sm:$0xff]  ;;  %s194_s24 = smov [#allocation7]   ;;  %s95_s28 = sshll.u32 %s230_s3, 4  ;;  %s96_s28 = int_to_ptr.hbm [resolvable:$true] %s95_s28 }
   0xc   :  { %66 = vmatpush.msra.mxu0 %v61_v0  ;;  %v59_v2 = vld [vmem:[#allocation5 + $0x68] sm:$0xff]  ;;  %v58_v3 = vld [vmem:[#allocation5 + $0x60] sm:$0xff]  ;;  %v57_v4 = vld [vmem:[#allocation5 + $0x58] sm:$0xff]  ;;  %s93_s25 = sshll.u32 %s194_s24, 4  ;;  %s94_s25 = int_to_ptr.vmem [resolvable:$true] %s93_s25 }
   0xd   :  { %v56_v5 = vld [vmem:[#allocation5 + $0x50] sm:$0xff]  ;;  %v55_v6 = vld [vmem:[#allocation5 + $0x48] sm:$0xff]  ;;  %v54_v7 = vld [vmem:[#allocation5 + $0x40] sm:$0xff] }
   0xe   :  { %67 = vmatpush.msra.mxu0 %v60_v1  ;;  %v53_v8 = vld [vmem:[#allocation5 + $0x38] sm:$0xff]  ;;  %v52_v9 = vld [vmem:[#allocation5 + $0x30] sm:$0xff]  ;;  %v51_v10 = vld [vmem:[#allocation5 + $0x28] sm:$0xff] }
   0xf   :  { %v50_v11 = vld [vmem:[#allocation5 + $0x20] sm:$0xff]  ;;  %v49_v12 = vld [vmem:[#allocation5 + $0x18] sm:$0xff]  ;;  %v48_v13 = vld [vmem:[#allocation5 + $0x10] sm:$0xff] }
  0x10   :  { %68 = vmatpush.msra.mxu0 %v59_v2  ;;  %v47_v14 = vld [vmem:[#allocation5 + $0x8] sm:$0xff]  ;;  %v46_v15 = vld [vmem:[#allocation5] sm:$0xff]  ;;  %v45_v16 = vld [vmem:[#allocation2] sm:$0xff] }
  0x11   :  { %v111_v17 = vld [vmem:[%s229_s2] ss:$0 sm:$0xff] }
  0x12   :  { %69 = vmatpush.msra.mxu0 %v58_v3 }
  0x14   :  { %70 = vmatpush.msra.mxu0 %v57_v4 }
  0x16   :  { %71 = vmatpush.msra.mxu0 %v56_v5 }
  0x18   :  { %72 = vmatpush.msra.mxu0 %v55_v6 }
  0x1a   :  { %73 = vmatpush.msra.mxu0 %v54_v7 }
  0x1c   :  { %74 = vmatpush.msra.mxu0 %v53_v8 }
  0x1e   :  { %75 = vmatpush.msra.mxu0 %v52_v9 }
  0x20   :  { %76 = vmatpush.msra.mxu0 %v51_v10 }
  0x22   :  { %77 = vmatpush.msra.mxu0 %v50_v11 }
  0x24   :  { %78 = vmatpush.msra.mxu0 %v49_v12 }
  0x26   :  { %79 = vmatpush.msra.mxu0 %v48_v13 }
  0x28   :  { %80 = vmatpush.msra.mxu0 %v47_v14 }
  0x2a   :  { %81 = vmatpush.msra.mxu0 %v46_v15 }
  0x2b   :  { %82 = vmatmul.f32.vlgmr.msra.gmra.mxu0 %v45_v16 }
  0xa8   :  { %v83_v18 = vpop.f32.mrf.mxu0 }
  0xa9   :  { %v84_v19 = vadd.f32 %v111_v17, %v83_v18 }
  0xab   :  { %v86_v20 = vmax.f32 %v84_v19, 0.0 }
  0xad   :  { %87 = vst [vmem:[#allocation7] sm:$0xff] %v86_v20 }
  0xae   :  { %98 = dma.vmem_to_hbm [thread:$0]  %s94_s25, 128, %s96_s28, [#allocation4]  }
  0xaf   :  { %188 = dma.done.wait [#allocation4], 128  }
  0xb0   :  { %189 = vsyncadd [#allocation4], 4294967168 }
  0xb1   :  { %103 = vsyncpa [#allocation3], 1 }
  0xb2   :  { %104 = vsyncpa [#allocation6], 1 }
  0xb3   :  { %105 = vsyncpa [#allocation4], 1 }

</bundles_post_ra>
